<compile_context>
chip_gen: v7x
topology: tpu7x:2x2x1
jax: 0.10.0
libtpu: 0.0.40
codegen_flags: <defaults>
</compile_context>

<pallas_src>
import jax
import jax.numpy as jnp
from jax.experimental import pallas as pl
from jax.experimental.pallas import tpu as pltpu


def _feature_extractor_kernel(x_ref, w1_ref, b1_ref, w2_ref, b2_ref, out_ref):
    # fc1 + ReLU
    h = jnp.dot(x_ref[...], w1_ref[...], preferred_element_type=jnp.float32)
    h = jnp.maximum(h + b1_ref[...], 0.0)          # (TB, h1) + (1, h1) broadcast
    # fc2 + ReLU
    y = jnp.dot(h, w2_ref[...], preferred_element_type=jnp.float32)
    out_ref[...] = jnp.maximum(y + b2_ref[...], 0.0)


def _round_up(n, m):
    return ((n + m - 1) // m) * m


def feature_extractor_forward(x, w1, b1, w2, b2, *, block_batch=1024):
    """x: (B, 310); w1: (310, h1); b1: (h1,); w2: (h1, h2); b2: (h2,).

    Weights are the transpose of the PyTorch nn.Linear .weight tensors.
    Returns (B, h2) float32.
    """
    x = x.astype(jnp.float32)                      # mirrors torch's x.float()
    w1 = w1.astype(jnp.float32)
    w2 = w2.astype(jnp.float32)

    B, K = x.shape
    assert K == w1.shape[0], "input feature dim must match fc1 in_features"
    h1 = w1.shape[1]
    h2 = w2.shape[1]
    assert w2.shape[0] == h1

    # --- Pad K (310 -> 384) to a multiple of 128 for lane-aligned loads. ---
    K_pad = _round_up(K, 128)
    if K_pad != K:
        x = jnp.pad(x, ((0, 0), (0, K_pad - K)))
        w1 = jnp.pad(w1, ((0, K_pad - K), (0, 0)))

    # --- Batch tile: multiple of 8 sublanes, sized for v7x's 64 MiB VMEM. ---
    TB = min(block_batch, max(8, _round_up(B, 8)))
    TB = _round_up(TB, 8)
    B_pad = _round_up(B, TB)
    if B_pad != B:
        x = jnp.pad(x, ((0, B_pad - B), (0, 0)))   # extra rows sliced off below

    b1_2d = b1.reshape(1, h1).astype(jnp.float32)
    b2_2d = b2.reshape(1, h2).astype(jnp.float32)

    out = pl.pallas_call(
        _feature_extractor_kernel,
        out_shape=jax.ShapeDtypeStruct((B_pad, h2), jnp.float32),
        grid=(B_pad // TB,),
        in_specs=[
            pl.BlockSpec((TB, K_pad), lambda i: (i, 0)),   # x: moves with grid
            pl.BlockSpec((K_pad, h1), lambda i: (0, 0)),   # w1: VMEM-resident
            pl.BlockSpec((1, h1), lambda i: (0, 0)),       # b1: VMEM-resident
            pl.BlockSpec((h1, h2), lambda i: (0, 0)),      # w2: VMEM-resident
            pl.BlockSpec((1, h2), lambda i: (0, 0)),       # b2: VMEM-resident
        ],
        out_specs=pl.BlockSpec((TB, h2), lambda i: (i, 0)),
        compiler_params=pltpu.CompilerParams(
            dimension_semantics=("parallel",),             # batch rows independent
        ),
    )(x, w1, b1_2d, w2, b2_2d)

    return out[:B] if B_pad != B else out


def _init_linear_params(key, in_features, out_features):
    # Deterministic init mimicking nn.Linear's U(-1/sqrt(in), 1/sqrt(in)).
    kw, kb = jax.random.split(key)
    bound = 1.0 / jnp.sqrt(jnp.float32(in_features))
    # Stored as (in, out) = PyTorch weight.T so the kernel can do x @ W.
    w = jax.random.uniform(kw, (in_features, out_features), jnp.float32,
                           minval=-bound, maxval=bound)
    b = jax.random.uniform(kb, (out_features,), jnp.float32,
                           minval=-bound, maxval=bound)
    return w, b


def _reference(x, w1, b1, w2, b2):
    h = jnp.maximum(x.astype(jnp.float32) @ w1 + b1, 0.0)
    return jnp.maximum(h @ w2 + b2, 0.0)


if __name__ == "__main__":
    # Small, module-consistent shapes: input feature dim must be 310 (fc1 in).
    batch = 8
    hidden_1 = 32
    hidden_2 = 16

    key = jax.random.PRNGKey(0)
    kx, k1, k2, kx2 = jax.random.split(key, 4)

    x = jax.random.normal(kx, (batch, 310), jnp.float32)
    w1, b1 = _init_linear_params(k1, 310, hidden_1)
    w2, b2 = _init_linear_params(k2, hidden_1, hidden_2)

    # Case 1: tiny batch (single grid step).
    out = feature_extractor_forward(x, w1, b1, w2, b2)
    out = jax.block_until_ready(out)
    ref = _reference(x, w1, b1, w2, b2)
    assert out.shape == (batch, hidden_2)
    assert jnp.allclose(out, ref, atol=1e-5, rtol=1e-5)

    # Case 2: exercise the multi-step batch-tiled grid + batch padding path.
    x_big = jax.random.normal(kx2, (40, 310), jnp.float32)
    out_big = feature_extractor_forward(x_big, w1, b1, w2, b2, block_batch=16)
    out_big = jax.block_until_ready(out_big)
    ref_big = _reference(x_big, w1, b1, w2, b2)
    assert out_big.shape == (40, hidden_2)
    assert jnp.allclose(out_big, ref_big, atol=1e-5, rtol=1e-5)

    print("KERNEL_OK")
</pallas_src>

<mosaic_0001>
module attributes {stable_mosaic.version = 11 : i64} {
  func.func @_feature_extractor_kernel(%arg0: i32, %arg1: memref<8x384xf32, #tpu.memory_space<vmem>>, %arg2: memref<384x32xf32, #tpu.memory_space<vmem>>, %arg3: memref<1x32xf32, #tpu.memory_space<vmem>>, %arg4: memref<32x16xf32, #tpu.memory_space<vmem>>, %arg5: memref<1x16xf32, #tpu.memory_space<vmem>>, %arg6: memref<8x16xf32, #tpu.memory_space<vmem>>) attributes {dimension_semantics = [#tpu.dimension_semantics<parallel>], iteration_bounds = array<i64: 1>, scalar_prefetch = 0 : i64, scratch_operands = 0 : i64, tpu.core_type = #tpu.core_type<tc>, window_params = [{transform_indices = @transform_0, window_bounds = array<i64: 8, 384>}, {pipeline_mode = #tpu.pipeline_mode<synchronous>, transform_indices = @transform_1, window_bounds = array<i64: 384, 32>}, {pipeline_mode = #tpu.pipeline_mode<synchronous>, transform_indices = @transform_2, window_bounds = array<i64: 1, 32>}, {pipeline_mode = #tpu.pipeline_mode<synchronous>, transform_indices = @transform_3, window_bounds = array<i64: 32, 16>}, {pipeline_mode = #tpu.pipeline_mode<synchronous>, transform_indices = @transform_4, window_bounds = array<i64: 1, 16>}, {transform_indices = @transform_5, window_bounds = array<i64: 8, 16>}]} {
    %c0 = arith.constant 0 : index
    %c0_0 = arith.constant 0 : index
    %0 = vector.load %arg1[%c0, %c0_0] : memref<8x384xf32, #tpu.memory_space<vmem>>, vector<8x384xf32>
    %c0_1 = arith.constant 0 : index
    %c0_2 = arith.constant 0 : index
    %1 = vector.load %arg2[%c0_1, %c0_2] : memref<384x32xf32, #tpu.memory_space<vmem>>, vector<384x32xf32>
    %cst = arith.constant dense<0.000000e+00> : vector<8x32xf32>
    %2 = tpu.matmul %0, %1, %cst {dimension_numbers = #tpu.dot_dimension_numbers<[1], [0], [0], [1], [0, 0, 1, 1], [], []>} : vector<8x384xf32>, vector<384x32xf32>, vector<8x32xf32> -> vector<8x32xf32>
    %c0_3 = arith.constant 0 : index
    %c0_4 = arith.constant 0 : index
    %3 = vector.load %arg3[%c0_3, %c0_4] : memref<1x32xf32, #tpu.memory_space<vmem>>, vector<1x32xf32>
    %4 = vector.broadcast %3 : vector<1x32xf32> to vector<8x32xf32>
    %5 = arith.addf %2, %4 : vector<8x32xf32>
    %cst_5 = arith.constant 0.000000e+00 : f32
    %6 = vector.broadcast %cst_5 : f32 to vector<8x32xf32>
    %7 = arith.maximumf %5, %6 : vector<8x32xf32>
    %c0_6 = arith.constant 0 : index
    %c0_7 = arith.constant 0 : index
    %8 = vector.load %arg4[%c0_6, %c0_7] : memref<32x16xf32, #tpu.memory_space<vmem>>, vector<32x16xf32>
    %cst_8 = arith.constant dense<0.000000e+00> : vector<8x16xf32>
    %9 = tpu.matmul %7, %8, %cst_8 {dimension_numbers = #tpu.dot_dimension_numbers<[1], [0], [0], [1], [0, 0, 1, 1], [], []>} : vector<8x32xf32>, vector<32x16xf32>, vector<8x16xf32> -> vector<8x16xf32>
    %c0_9 = arith.constant 0 : index
    %c0_10 = arith.constant 0 : index
    %10 = vector.load %arg5[%c0_9, %c0_10] : memref<1x16xf32, #tpu.memory_space<vmem>>, vector<1x16xf32>
    %11 = vector.broadcast %10 : vector<1x16xf32> to vector<8x16xf32>
    %12 = arith.addf %9, %11 : vector<8x16xf32>
    %cst_11 = arith.constant 0.000000e+00 : f32
    %13 = vector.broadcast %cst_11 : f32 to vector<8x16xf32>
    %14 = arith.maximumf %12, %13 : vector<8x16xf32>
    %c0_12 = arith.constant 0 : index
    %c0_13 = arith.constant 0 : index
    %15 = vector.load %arg6[%c0_12, %c0_13] : memref<8x16xf32, #tpu.memory_space<vmem>>, vector<8x16xf32>
    tpu.vector_store %arg6[%c0_12, %c0_13], %14 {strides = array<i32>} : memref<8x16xf32, #tpu.memory_space<vmem>>, vector<8x16xf32>,
    return
  }
  func.func @transform_0(%arg0: i32) -> (i32, i32) {
    %c0_i32 = arith.constant 0 : i32
    %c0_i32_0 = arith.constant 0 : i32
    return %arg0, %c0_i32 : i32, i32
  }
  func.func @transform_1(%arg0: i32) -> (i32, i32) {
    %c0_i32 = arith.constant 0 : i32
    %c0_i32_0 = arith.constant 0 : i32
    %c0_i32_1 = arith.constant 0 : i32
    return %c0_i32, %c0_i32_0 : i32, i32
  }
  func.func @transform_2(%arg0: i32) -> (i32, i32) {
    %c0_i32 = arith.constant 0 : i32
    %c0_i32_0 = arith.constant 0 : i32
    %c0_i32_1 = arith.constant 0 : i32
    return %c0_i32, %c0_i32_0 : i32, i32
  }
  func.func @transform_3(%arg0: i32) -> (i32, i32) {
    %c0_i32 = arith.constant 0 : i32
    %c0_i32_0 = arith.constant 0 : i32
    %c0_i32_1 = arith.constant 0 : i32
    return %c0_i32, %c0_i32_0 : i32, i32
  }
  func.func @transform_4(%arg0: i32) -> (i32, i32) {
    %c0_i32 = arith.constant 0 : i32
    %c0_i32_0 = arith.constant 0 : i32
    %c0_i32_1 = arith.constant 0 : i32
    return %c0_i32, %c0_i32_0 : i32, i32
  }
  func.func @transform_5(%arg0: i32) -> (i32, i32) {
    %c0_i32 = arith.constant 0 : i32
    %c0_i32_0 = arith.constant 0 : i32
    return %arg0, %c0_i32 : i32, i32
  }
}

</mosaic_0001>

<bundles_post_ra>
// kernel: tpu_custom_call.1
= control target key start
LH: loop header
LB: loop body
LE: loop exit
PB: predicated region body
PF: predicated region fallthrough
CT: control target
= control target key end

     0   :  { %v518_v7 = vmov 0.0|0.0   ;;  %vm519_vm0 = vmmov 0   ;;  %v520_v8 = vmov 0.0   ;;  %s749_s0 = inlined_call_operand.vmem [shape: f32[8,384], index: 0, kind: input, shape index: {}]   ;;  %s750_s1 = inlined_call_operand.vmem [shape: f32[384,32], index: 1, kind: input, shape index: {}]   ;;  %s751_s2 = inlined_call_operand.vmem [shape: f32[1,32], index: 2, kind: input, shape index: {}]   ;;  %s752_s3 = inlined_call_operand.vmem [shape: f32[32,16], index: 3, kind: input, shape index: {}]   ;;  %s753_s4 = inlined_call_operand.vmem [shape: f32[1,16], index: 4, kind: input, shape index: {}]   ;;  %s754_s5 = inlined_call_operand.hbm [shape: f32[8,16], index: 5, kind: output, shape index: {}]  }
   0x1   :  { %v40_v0 = vld [vmem:[%s750_s1 + $0x80] sm:$0xff]  ;;  %v41_v1 = vld [vmem:[%s750_s1 + $0x88] sm:$0xff]  ;;  %v42_v5 = vld [vmem:[%s750_s1 + $0x90] sm:$0xff]  ;;  %460 = vmatprep.subr.bf16.mxu1 %v518_v7  ;;  %414 = vmatprep.mubr.msk.f32.mxu1 %vm519_vm0, %v520_v8 }
   0x2   :  { %v24_v2 = vld [vmem:[%s750_s1] sm:$0xff]  ;;  %v428_v3 = vpack.c.bf16 %v41_v1, %v40_v0  ;;  %v25_v4 = vld [vmem:[%s750_s1 + $0x8] sm:$0xff]  ;;  %v43_v6 = vld [vmem:[%s750_s1 + $0x98] sm:$0xff] }
   0x3   :  { %v430_v9 = vpack.c.bf16 %v25_v4, %v24_v2  ;;  %v432_v10 = vpack.c.bf16 %v43_v6, %v42_v5  ;;  %v26_v11 = vld [vmem:[%s750_s1 + $0x10] sm:$0xff]  ;;  %v27_v12 = vld [vmem:[%s750_s1 + $0x18] sm:$0xff]  ;;  %v56_v13 = vld [vmem:[%s750_s1 + $0x100] sm:$0xff] }
   0x4   :  { %429 = vmatprep.subr.bf16.mxu0 %v428_v3  ;;  %v57_v14 = vld [vmem:[%s750_s1 + $0x108] sm:$0xff]  ;;  %v44_v15 = vld [vmem:[%s750_s1 + $0xa0] sm:$0xff]  ;;  %v434_v17 = vpack.c.bf16 %v27_v12, %v26_v11  ;;  %v58_v19 = vld [vmem:[%s750_s1 + $0x110] sm:$0xff] }
   0x5   :  { %v45_v16 = vld [vmem:[%s750_s1 + $0xa8] sm:$0xff]  ;;  %431 = vmatpush3.bf16.msra.mxu0 %v430_v9  ;;  %v461_v18 = vpack.c.bf16 %v57_v14, %v56_v13  ;;  %v28_v21 = vld [vmem:[%s750_s1 + $0x20] sm:$0xff]  ;;  %v59_v23 = vld [vmem:[%s750_s1 + $0x118] sm:$0xff] }
   0x6   :  { %433 = vmatprep.subr.bf16.mxu0 %v432_v10  ;;  %v436_v20 = vpack.c.bf16 %v45_v16, %v44_v15  ;;  %v29_v22 = vld [vmem:[%s750_s1 + $0x28] sm:$0xff]  ;;  %v464_v24 = vpack.c.bf16 %v59_v23, %v58_v19  ;;  %v46_v25 = vld [vmem:[%s750_s1 + $0xb0] sm:$0xff]  ;;  %v47_v26 = vld [vmem:[%s750_s1 + $0xb8] sm:$0xff] }
   0x7   :  { %462 = vmatpush3.bf16.msra.mxu1 %v461_v18  ;;  %v60_v27 = vld [vmem:[%s750_s1 + $0x120] sm:$0xff]  ;;  %v61_v28 = vld [vmem:[%s750_s1 + $0x128] sm:$0xff]  ;;  %v438_v29 = vpack.c.bf16 %v29_v22, %v28_v21  ;;  %v440_v30 = vpack.c.bf16 %v47_v26, %v46_v25  ;;  %v30_v31 = vld [vmem:[%s750_s1 + $0x30] sm:$0xff] }
   0x8   :  { %463 = vmatprep.subr.bf16.mxu1 %v518_v7  ;;  %v31_v32 = vld [vmem:[%s750_s1 + $0x38] sm:$0xff]  ;;  %v467_v33 = vpack.c.bf16 %v61_v28, %v60_v27  ;;  %v48_v34 = vld [vmem:[%s750_s1 + $0xc0] sm:$0xff]  ;;  %v49_v35 = vld [vmem:[%s750_s1 + $0xc8] sm:$0xff] }
   0x9   :  { %435 = vmatpush3.bf16.msra.mxu0 %v434_v17  ;;  %v62_v36 = vld [vmem:[%s750_s1 + $0x130] sm:$0xff]  ;;  %v63_v37 = vld [vmem:[%s750_s1 + $0x138] sm:$0xff]  ;;  %v442_v38 = vpack.c.bf16 %v31_v32, %v30_v31  ;;  %v444_v39 = vpack.c.bf16 %v49_v35, %v48_v34  ;;  %v32_v40 = vld [vmem:[%s750_s1 + $0x40] sm:$0xff] }
   0xa   :  { %437 = vmatprep.subr.bf16.mxu0 %v436_v20  ;;  %v33_v41 = vld [vmem:[%s750_s1 + $0x48] sm:$0xff]  ;;  %v470_v42 = vpack.c.bf16 %v63_v37, %v62_v36  ;;  %v50_v43 = vld [vmem:[%s750_s1 + $0xd0] sm:$0xff]  ;;  %v51_v44 = vld [vmem:[%s750_s1 + $0xd8] sm:$0xff] }
   0xb   :  { %465 = vmatpush3.bf16.msra.mxu1 %v464_v24  ;;  %v64_v45 = vld [vmem:[%s750_s1 + $0x140] sm:$0xff]  ;;  %v65_v46 = vld [vmem:[%s750_s1 + $0x148] sm:$0xff]  ;;  %v446_v48 = vpack.c.bf16 %v33_v41, %v32_v40  ;;  %v448_v49 = vpack.c.bf16 %v51_v44, %v50_v43  ;;  %v34_v50 = vld [vmem:[%s750_s1 + $0x50] sm:$0xff] }
   0xc   :  { %466 = vmatprep.subr.bf16.mxu1 %v518_v7  ;;  %v22_v47 = vld [vmem:[%s749_s0 + $0x8] sm:$0xff]  ;;  %v35_v51 = vld [vmem:[%s750_s1 + $0x58] sm:$0xff] }
   0xd   :  { %439 = vmatpush3.bf16.msra.mxu0 %v438_v29  ;;  %143 = vmatprep.mubr.f32.mxu0 %v22_v47 }
   0xe   :  { %441 = vmatprep.subr.bf16.mxu0 %v440_v30 }
   0xf   :  { %468 = vmatpush3.bf16.msra.mxu1 %v467_v33 }
  0x10   :  { %469 = vmatprep.subr.bf16.mxu1 %v518_v7 }
  0x11   :  { %443 = vmatpush3.bf16.msra.mxu0 %v442_v38 }
  0x12   :  { %445 = vmatprep.subr.bf16.mxu0 %v444_v39 }
  0x13   :  { %10 = vsyncpa [#allocation3], 0  ;;  %471 = vmatpush3.bf16.msra.mxu1 %v470_v42  ;;  %v473_v52 = vpack.c.bf16 %v65_v46, %v64_v45  ;;  %v52_v53 = vld [vmem:[%s750_s1 + $0xe0] sm:$0xff]  ;;  %v53_v54 = vld [vmem:[%s750_s1 + $0xe8] sm:$0xff]  ;;  %v450_v57 = vpack.c.bf16 %v35_v51, %v34_v50  ;;  %vm231_vm1 = vcmask 261120   ;;  %vm306_vm2 = vcmask 130048  }
  0x14   :  { %472 = vmatprep.subr.bf16.mxu1 %v518_v7  ;;  %v66_v55 = vld [vmem:[%s750_s1 + $0x150] sm:$0xff]  ;;  %v67_v56 = vld [vmem:[%s750_s1 + $0x158] sm:$0xff]  ;;  %v452_v58 = vpack.c.bf16 %v53_v54, %v52_v53  ;;  %v36_v59 = vld [vmem:[%s750_s1 + $0x60] sm:$0xff] }
  0x15   :  { %447 = vmatpush3.bf16.msra.mxu0 %v446_v48  ;;  %v37_v60 = vld [vmem:[%s750_s1 + $0x68] sm:$0xff]  ;;  %v476_v61 = vpack.c.bf16 %v67_v56, %v66_v55  ;;  %v54_v62 = vld [vmem:[%s750_s1 + $0xf0] sm:$0xff]  ;;  %v55_v63 = vld [vmem:[%s750_s1 + $0xf8] sm:$0xff] }
  0x16   :  { %449 = vmatprep.subr.bf16.mxu0 %v448_v49  ;;  %v68_v0 = vld [vmem:[%s750_s1 + $0x160] sm:$0xff]  ;;  %v69_v1 = vld [vmem:[%s750_s1 + $0x168] sm:$0xff]  ;;  %v454_v2 = vpack.c.bf16 %v37_v60, %v36_v59  ;;  %v456_v3 = vpack.c.bf16 %v55_v63, %v54_v62  ;;  %v38_v4 = vld [vmem:[%s750_s1 + $0x70] sm:$0xff] }
  0x17   :  { %474 = vmatpush3.bf16.msra.mxu1 %v473_v52  ;;  %v39_v5 = vld [vmem:[%s750_s1 + $0x78] sm:$0xff]  ;;  %v479_v6 = vpack.c.bf16 %v69_v1, %v68_v0  ;;  %v70_v9 = vld [vmem:[%s750_s1 + $0x170] sm:$0xff]  ;;  %v21_v13 = vld [vmem:[%s749_s0] sm:$0xff] }
  0x18   :  { %475 = vmatprep.subr.bf16.mxu1 %v518_v7  ;;  %v71_v10 = vld [vmem:[%s750_s1 + $0x178] sm:$0xff]  ;;  %v458_v11 = vpack.c.bf16 %v39_v5, %v38_v4  ;;  %v23_v14 = vld [vmem:[%s749_s0 + $0x10] sm:$0xff]  ;;  %v220_v15 = vld [vmem:[%s752_s3] sm:$0xff] }
  0x19   :  { %451 = vmatpush3.bf16.msra.mxu0 %v450_v57  ;;  %v482_v12 = vpack.c.bf16 %v71_v10, %v70_v9  ;;  %v221_v16 = vld [vmem:[%s752_s3 + $0x8] sm:$0xff]  ;;  %v222_v18 = vld [vmem:[%s752_s3 + $0x10] sm:$0xff]  ;;  %v322_v22 = vld [vmem:[%s751_s2] ss:$0 sm:$0xff] }
  0x1a   :  { %453 = vmatprep.subr.bf16.mxu0 %v452_v58  ;;  %v485_v17 = vpack.c.bf16 %v221_v16, %v220_v15  ;;  %v323_v28 = vld [vmem:[%s753_s4] ss:$0 sm:$0xff] }
  0x1b   :  { %477 = vmatpush3.bf16.msra.mxu1 %v476_v61 }
  0x1c   :  { %478 = vmatprep.subr.bf16.mxu1 %v518_v7 }
  0x1d   :  { %455 = vmatpush3.bf16.msra.mxu0 %v454_v2 }
  0x1e   :  { %457 = vmatprep.subr.bf16.mxu0 %v456_v3 }
  0x1f   :  { %480 = vmatpush3.bf16.msra.mxu1 %v479_v6 }
  0x20   :  { %481 = vmatprep.subr.bf16.mxu1 %v518_v7 }
  0x21   :  { %459 = vmatpush3.bf16.msra.mxu0 %v458_v11 }
  0x22   :  { %484 = vmatprep.subr.bf16.mxu0 %v518_v7 }
  0x23   :  { %483 = vmatpush3.bf16.msra.mxu1 %v482_v12 }
  0x24   :  { %144 = vmatmul.mubr.f32.vlgmr.msra.gmra.mrb[0].mxu0 %v21_v13 }
  0x25   :  { %425 = vmatprep.mubr.msk.f32.mxu0 %vm519_vm0, %v520_v8  ;;  %486 = vmatpush3.bf16.msra.mxu0 %v485_v17  ;;  %v223_v8 = vld [vmem:[%s752_s3 + $0x18] sm:$0xff]  ;;  %s521_s3 = smov [#allocation2]  }
  0x26   :  { %415 = vmatmul.mubr.f32.vlgmr.msra.gmra.mrb[0].mxu1 %v23_v14  ;;  %487 = vmatprep.subr.bf16.mxu0 %v518_v7  ;;  %v488_v19 = vpack.c.bf16 %v223_v8, %v222_v18  ;;  %s314_s30 = sshll.u32 %s521_s3, 4  ;;  %s315_s30 = int_to_ptr.vmem [resolvable:$true] %s314_s30 }
  0x27   :  { %s494_s2 = scalar_lea.vmem %s315_s30, 128  ;;  %p499_p1 = scmp.lt.s32.totalorder %s315_s30, %s315_s30 }
  0x28   :  { %p495_p0 = scmp.ne.s32.totalorder %s315_s30, %s494_s2  ;;  %p500_p2 = scmp.lt.s32.totalorder %s494_s2, %s494_s2 }
  0x29   :  { %489 = vmatpush3.bf16.msra.mxu0 %v488_v19 }
  0x2a   :  { %p501_p3 = por %p500_p2, %p499_p1 }
  0x2c   :  { %p502_p4 = pnand %p501_p3, %p495_p0 }
  0xf7   :  { %v357_v20 = vpop.f32.mrb[0].mxu0 }
  0xf8   :  { %v358_v21 = vpop.f32.mrb[1].mxu0 }
  0xf9   :  { %v359_v23 = vadd.f32 %v358_v21, %v357_v20  ;;  %v215_v24 = vpop.f32.mrb[0].mxu1 }
  0xfa   :  { %v416_v25 = vpop.f32.mrb[1].mxu1 }
  0xfb   :  { %v146_v7 = vadd.f32 %v359_v23, %v322_v22 }
  0xfd   :  { %v216_v26 = vadd.f32 %v215_v24, %v146_v7 }
  0xff   :  { %v219_v27 = vmax.f32 %v216_v26, 0.0 }
 0x101   :  { %426 = vmatmul.mubr.msk.f32.vlgmr.msra.gmra.mrb[2].mxu0 %vm231_vm1, %v219_v27 }
 0x1d4   :  { %v301_v29 = vpop.f32.mrb[2].mxu0 }
 0x1d5   :  { %v302_v30 = vadd.f32 %v323_v28, %v301_v29  ;;  %v427_v31 = vpop.f32.mrb[3].mxu0 }
 0x1d7   :  { %v305_v32 = vmax.f32 %v302_v30, 0.0 }
 0x1d9   :  { %307 = vst.msk [vmem:[#allocation2] sm:$0xff] %vm306_vm2, %v305_v32 }
 0x1da   :  { %505 = shalt.err (!%p502_p4)
}
 0x1db   :  { %s506_s4 = scalar_lea.hbm %s754_s5, 128 }
 0x1dc   :  { %p507_p5 = scmp.ne.s32.totalorder %s754_s5, %s506_s4  ;;  %p510_p6 = scmp.lt.u32.totalorder %s506_s4, %s754_s5 }
 0x1de   :  { %p512_p7 = pnand %p510_p6, %p507_p5 }
 0x1e0   :  { %515 = shalt.err (!%p512_p7)
}
 0x1e1   :  { %317 = dma.vmem_to_hbm [thread:$0]  %s315_s30, 128, %s754_s5, [#allocation3]  }
 0x1e2   :  { %516 = dma.done.wait [#allocation3], 128  }
 0x1e3   :  { %517 = vsyncadd [#allocation3], 4294967168 }
 0x1e4   :  { %321 = vsyncpa [#allocation3], 1 }

</bundles_post_ra>
